<compile_context>
chip_gen: v7x
topology: tpu7x:2x2x1
jax: 0.10.0
libtpu: 0.0.40
codegen_flags: <defaults>
</compile_context>

<pallas_src>
import jax
import jax.numpy as jnp
from jax import lax
from jax.experimental import pallas as pl
from jax.experimental.pallas import tpu as pltpu

_BN_EPS = 1e-5


def dense_vanilla_block_kernel(x_ref, w_ref, b_ref, gamma_ref, beta_ref, o_ref):
    # Linear: x (B, F_in) contracted with W (TILE_N, F_in) on the feature axis
    # -> (B, TILE_N).  Native-dtype operands, f32 accumulation on the MXU.
    y = lax.dot_general(
        x_ref[...], w_ref[...],
        dimension_numbers=(((1,), (1,)), ((), ())),
        preferred_element_type=jnp.float32,
    ) + b_ref[...].astype(jnp.float32)

    # Activation: ReLU (VPU).
    a = jnp.maximum(y, 0.0)

    # BatchNorm1d (training mode): biased stats over the (untiled) batch axis.
    # Single pass: sum and sum-of-squares, then var = E[a^2] - mean^2.
    inv_b = 1.0 / a.shape[0]
    s1 = jnp.sum(a, axis=0, keepdims=True)          # (1, TILE_N)
    s2 = jnp.sum(a * a, axis=0, keepdims=True)      # (1, TILE_N)
    mean = s1 * inv_b
    var = jnp.maximum(s2 * inv_b - mean * mean, 0.0)
    inv_std = lax.rsqrt(var + _BN_EPS)

    # Fold affine into one scale/shift FMA over the big (B, TILE_N) tensor.
    scale = inv_std * gamma_ref[...].astype(jnp.float32)
    shift = beta_ref[...].astype(jnp.float32) - mean * scale
    o_ref[...] = (a * scale + shift).astype(o_ref.dtype)


def _round_up(a, m):
    return -(-a // m) * m


def dense_vanilla_block(x, weight, bias, gamma, beta):
    """x: (B, F_in); weight: (F_out, F_in); bias/gamma/beta: (F_out,)."""
    B, f_in = x.shape
    f_out = weight.shape[0]
    itemsize = jnp.dtype(x.dtype).itemsize

    # --- choose a lane-dense TILE_N against a conservative VMEM budget ------
    def tile_bytes(tn):
        return (2 * B * f_in * itemsize          # x block (worst case double-buffered)
                + 2 * tn * f_in * itemsize       # W tile, double-buffered
                + 2 * B * tn * 4                 # out tile (f32-sized bound), double-buffered
                + 2 * 3 * tn * itemsize)         # bias / gamma / beta rows

    budget = 24 << 20                            # fits v7x's smaller VMEM too
    f_out_p128 = _round_up(f_out, 128)
    tile_n = 128
    for cand in (256, 512):
        if cand <= f_out_p128 and tile_bytes(cand) <= budget:
            tile_n = cand
    f_out_pad = _round_up(f_out, tile_n)

    # --- pad params along F_out so the output is lane-dense -----------------
    pad = f_out_pad - f_out
    if pad:
        weight = jnp.pad(weight, ((0, pad), (0, 0)))
        bias = jnp.pad(bias, (0, pad))
        gamma = jnp.pad(gamma, (0, pad), constant_values=1.0)
        beta = jnp.pad(beta, (0, pad))

    b_row = bias.reshape(1, f_out_pad)
    g_row = gamma.reshape(1, f_out_pad)
    beta_row = beta.reshape(1, f_out_pad)

    grid = (f_out_pad // tile_n,)
    vmem_limit = int(min(max(2 * tile_bytes(tile_n), 16 << 20), 64 << 20))

    out = pl.pallas_call(
        dense_vanilla_block_kernel,
        out_shape=jax.ShapeDtypeStruct((B, f_out_pad), x.dtype),
        grid_spec=pltpu.PrefetchScalarGridSpec(
            num_scalar_prefetch=0,
            grid=grid,
            in_specs=[
                pl.BlockSpec((B, f_in), lambda j: (0, 0)),       # x: full batch column
                pl.BlockSpec((tile_n, f_in), lambda j: (j, 0)),  # W tile, untransposed
                pl.BlockSpec((1, tile_n), lambda j: (0, j)),     # bias row
                pl.BlockSpec((1, tile_n), lambda j: (0, j)),     # gamma row
                pl.BlockSpec((1, tile_n), lambda j: (0, j)),     # beta row
            ],
            out_specs=pl.BlockSpec((B, tile_n), lambda j: (0, j)),
        ),
        compiler_params=pltpu.CompilerParams(
            dimension_semantics=("parallel",),
            vmem_limit_bytes=vmem_limit,
        ),
    )(x, weight, b_row, g_row, beta_row)

    return out[:, :f_out] if pad else out


def reference(x, weight, bias, gamma, beta, eps=_BN_EPS):
    y = x @ weight.T + bias
    a = jnp.maximum(y, 0.0)
    mean = jnp.mean(a, axis=0, keepdims=True)
    var = jnp.mean((a - mean) ** 2, axis=0, keepdims=True)
    return (a - mean) / jnp.sqrt(var + eps) * gamma + beta


if __name__ == "__main__":
    key = jax.random.PRNGKey(0)
    k_x, k_w, k_b = jax.random.split(key, 3)

    B, in_features, out_features = 8, 32, 64

    x = jax.random.normal(k_x, (B, in_features), dtype=jnp.float32)

    # kaiming_normal_(nonlinearity='relu'): std = sqrt(2 / fan_in)
    w_std = (2.0 / in_features) ** 0.5
    weight = jax.random.normal(k_w, (out_features, in_features), dtype=jnp.float32) * w_std
    # nn.Linear default bias init: U(-1/sqrt(fan_in), 1/sqrt(fan_in))
    bound = 1.0 / (in_features ** 0.5)
    bias = jax.random.uniform(k_b, (out_features,), dtype=jnp.float32,
                              minval=-bound, maxval=bound)
    # BatchNorm1d affine params at init
    gamma = jnp.ones((out_features,), dtype=jnp.float32)
    beta = jnp.zeros((out_features,), dtype=jnp.float32)

    out = dense_vanilla_block(x, weight, bias, gamma, beta)
    out = jax.block_until_ready(out)

    ref = reference(x, weight, bias, gamma, beta)
    assert out.shape == (B, out_features)
    assert jnp.allclose(out, ref, atol=1e-4, rtol=1e-4), "mismatch vs reference"

    print("KERNEL_OK")
</pallas_src>

<mosaic_0001>
module attributes {stable_mosaic.version = 11 : i64} {
  func.func @dense_vanilla_block_kernel(%arg0: i32, %arg1: memref<8x32xf32, #tpu.memory_space<vmem>>, %arg2: memref<128x32xf32, #tpu.memory_space<vmem>>, %arg3: memref<1x128xf32, #tpu.memory_space<vmem>>, %arg4: memref<1x128xf32, #tpu.memory_space<vmem>>, %arg5: memref<1x128xf32, #tpu.memory_space<vmem>>, %arg6: memref<8x128xf32, #tpu.memory_space<vmem>>) attributes {dimension_semantics = [#tpu.dimension_semantics<parallel>], iteration_bounds = array<i64: 1>, scalar_prefetch = 0 : i64, scratch_operands = 0 : i64, tpu.core_type = #tpu.core_type<tc>, window_params = [{pipeline_mode = #tpu.pipeline_mode<synchronous>, transform_indices = @transform_0, window_bounds = array<i64: 8, 32>}, {transform_indices = @transform_1, window_bounds = array<i64: 128, 32>}, {transform_indices = @transform_2, window_bounds = array<i64: 1, 128>}, {transform_indices = @transform_3, window_bounds = array<i64: 1, 128>}, {transform_indices = @transform_4, window_bounds = array<i64: 1, 128>}, {transform_indices = @transform_5, window_bounds = array<i64: 8, 128>}]} {
    %c0 = arith.constant 0 : index
    %c0_0 = arith.constant 0 : index
    %0 = vector.load %arg1[%c0, %c0_0] : memref<8x32xf32, #tpu.memory_space<vmem>>, vector<8x32xf32>
    %c0_1 = arith.constant 0 : index
    %c0_2 = arith.constant 0 : index
    %1 = vector.load %arg2[%c0_1, %c0_2] : memref<128x32xf32, #tpu.memory_space<vmem>>, vector<128x32xf32>
    %cst = arith.constant dense<0.000000e+00> : vector<8x128xf32>
    %2 = tpu.matmul %0, %1, %cst {dimension_numbers = #tpu.dot_dimension_numbers<[1], [1], [0], [0], [0, 0, 1, 0], [], []>} : vector<8x32xf32>, vector<128x32xf32>, vector<8x128xf32> -> vector<8x128xf32>
    %c0_3 = arith.constant 0 : index
    %c0_4 = arith.constant 0 : index
    %3 = vector.load %arg3[%c0_3, %c0_4] : memref<1x128xf32, #tpu.memory_space<vmem>>, vector<1x128xf32>
    %4 = vector.broadcast %3 : vector<1x128xf32> to vector<8x128xf32>
    %5 = arith.addf %2, %4 : vector<8x128xf32>
    %cst_5 = arith.constant 0.000000e+00 : f32
    %6 = vector.broadcast %cst_5 : f32 to vector<8x128xf32>
    %7 = arith.maximumf %5, %6 : vector<8x128xf32>
    %cst_6 = arith.constant dense<0.000000e+00> : vector<128xf32>
    %8 = vector.multi_reduction <add>, %7, %cst_6 [0] : vector<8x128xf32> to vector<128xf32>
    %9 = vector.shape_cast %8 : vector<128xf32> to vector<1x128xf32>
    %10 = arith.mulf %7, %7 : vector<8x128xf32>
    %cst_7 = arith.constant dense<0.000000e+00> : vector<128xf32>
    %11 = vector.multi_reduction <add>, %10, %cst_7 [0] : vector<8x128xf32> to vector<128xf32>
    %12 = vector.shape_cast %11 : vector<128xf32> to vector<1x128xf32>
    %cst_8 = arith.constant 1.250000e-01 : f32
    %13 = vector.broadcast %cst_8 : f32 to vector<1x128xf32>
    %14 = arith.mulf %9, %13 : vector<1x128xf32>
    %cst_9 = arith.constant 1.250000e-01 : f32
    %15 = vector.broadcast %cst_9 : f32 to vector<1x128xf32>
    %16 = arith.mulf %12, %15 : vector<1x128xf32>
    %17 = arith.mulf %14, %14 : vector<1x128xf32>
    %18 = arith.subf %16, %17 : vector<1x128xf32>
    %cst_10 = arith.constant 0.000000e+00 : f32
    %19 = vector.broadcast %cst_10 : f32 to vector<1x128xf32>
    %20 = arith.maximumf %18, %19 : vector<1x128xf32>
    %cst_11 = arith.constant 9.99999974E-6 : f32
    %21 = vector.broadcast %cst_11 : f32 to vector<1x128xf32>
    %22 = arith.addf %20, %21 : vector<1x128xf32>
    %23 = math.rsqrt %22 : vector<1x128xf32>
    %c0_12 = arith.constant 0 : index
    %c0_13 = arith.constant 0 : index
    %24 = vector.load %arg4[%c0_12, %c0_13] : memref<1x128xf32, #tpu.memory_space<vmem>>, vector<1x128xf32>
    %25 = arith.mulf %23, %24 : vector<1x128xf32>
    %c0_14 = arith.constant 0 : index
    %c0_15 = arith.constant 0 : index
    %26 = vector.load %arg5[%c0_14, %c0_15] : memref<1x128xf32, #tpu.memory_space<vmem>>, vector<1x128xf32>
    %27 = arith.mulf %14, %25 : vector<1x128xf32>
    %28 = arith.subf %26, %27 : vector<1x128xf32>
    %29 = vector.broadcast %25 : vector<1x128xf32> to vector<8x128xf32>
    %30 = arith.mulf %7, %29 : vector<8x128xf32>
    %31 = vector.broadcast %28 : vector<1x128xf32> to vector<8x128xf32>
    %32 = arith.addf %30, %31 : vector<8x128xf32>
    %c0_16 = arith.constant 0 : index
    %c0_17 = arith.constant 0 : index
    %33 = vector.load %arg6[%c0_16, %c0_17] : memref<8x128xf32, #tpu.memory_space<vmem>>, vector<8x128xf32>
    tpu.vector_store %arg6[%c0_16, %c0_17], %32 {strides = array<i32>} : memref<8x128xf32, #tpu.memory_space<vmem>>, vector<8x128xf32>,
    return
  }
  func.func @transform_0(%arg0: i32) -> (i32, i32) {
    %c0_i32 = arith.constant 0 : i32
    %c0_i32_0 = arith.constant 0 : i32
    %c0_i32_1 = arith.constant 0 : i32
    return %c0_i32, %c0_i32_0 : i32, i32
  }
  func.func @transform_1(%arg0: i32) -> (i32, i32) {
    %c0_i32 = arith.constant 0 : i32
    %c0_i32_0 = arith.constant 0 : i32
    return %arg0, %c0_i32 : i32, i32
  }
  func.func @transform_2(%arg0: i32) -> (i32, i32) {
    %c0_i32 = arith.constant 0 : i32
    %c0_i32_0 = arith.constant 0 : i32
    return %c0_i32, %arg0 : i32, i32
  }
  func.func @transform_3(%arg0: i32) -> (i32, i32) {
    %c0_i32 = arith.constant 0 : i32
    %c0_i32_0 = arith.constant 0 : i32
    return %c0_i32, %arg0 : i32, i32
  }
  func.func @transform_4(%arg0: i32) -> (i32, i32) {
    %c0_i32 = arith.constant 0 : i32
    %c0_i32_0 = arith.constant 0 : i32
    return %c0_i32, %arg0 : i32, i32
  }
  func.func @transform_5(%arg0: i32) -> (i32, i32) {
    %c0_i32 = arith.constant 0 : i32
    %c0_i32_0 = arith.constant 0 : i32
    return %c0_i32, %arg0 : i32, i32
  }
}

</mosaic_0001>

<bundles_post_ra>
// kernel: tpu_custom_call.1
= control target key start
LH: loop header
LB: loop body
LE: loop exit
PB: predicated region body
PF: predicated region fallthrough
CT: control target
= control target key end

     0   :  { %vm45_vm0 = vcmask 261120   ;;  %v352_v2 = vmov 0.0|0.0   ;;  %vm353_vm2 = vmmov 0   ;;  %v354_v5 = vmov 0.0   ;;  %s481_s0 = inlined_call_operand.vmem [shape: f32[8,32], index: 0, kind: input, shape index: {}]   ;;  %s482_s1 = inlined_call_operand.vmem [shape: f32[128,32], index: 1, kind: input, shape index: {}]   ;;  %s483_s2 = inlined_call_operand.vmem [shape: f32[1,128], index: 2, kind: input, shape index: {}]   ;;  %s484_s3 = inlined_call_operand.vmem [shape: f32[1,128], index: 3, kind: input, shape index: {}]   ;;  %s485_s4 = inlined_call_operand.vmem [shape: f32[1,128], index: 4, kind: input, shape index: {}]   ;;  %s486_s5 = inlined_call_operand.hbm [shape: f32[8,128], index: 5, kind: output, shape index: {}]  }
   0x1   :  { %v22_v0 = vld [vmem:[%s482_s1] sm:$0xff]  ;;  %v23_v1 = vld [vmem:[%s482_s1 + $0x8] sm:$0xff]  ;;  %290 = vmatprep.subr.bf16.mxu0 %v352_v2  ;;  %vm394_vm1 = vmpackc.low %vm45_vm0, %vm45_vm0  ;;  %287 = vmatprep.mubr.msk.f32.mxu0 %vm353_vm2, %v354_v5 }
   0x2   :  { %v291_v3 = vpack.c.bf16 %v23_v1, %v22_v0  ;;  %v24_v6 = vld [vmem:[%s482_s1 + $0x10] sm:$0xff]  ;;  %v25_v7 = vld [vmem:[%s482_s1 + $0x18] sm:$0xff] }
   0x4   :  { %293 = vmatpush3.bf16.xpose.msk.msra.mxu0 %vm394_vm1, %v291_v3 }
   0x5   :  { %294 = vmatprep.subr.bf16.mxu0 %v352_v2 }
   0x6   :  { %10 = vsyncpa [#allocation3], 0  ;;  %v295_v8 = vpack.c.bf16 %v25_v7, %v24_v6  ;;  %v26_v9 = vld [vmem:[%s482_s1 + $0x20] sm:$0xff]  ;;  %v27_v10 = vld [vmem:[%s482_s1 + $0x28] sm:$0xff]  ;;  %v193_v52 = vlaneseq  ;;  %s355_s30 = smov [#allocation2]  }
   0x7   :  { %v299_v11 = vpack.c.bf16 %v27_v10, %v26_v9  ;;  %v28_v12 = vld [vmem:[%s482_s1 + $0x30] sm:$0xff]  ;;  %v29_v13 = vld [vmem:[%s482_s1 + $0x38] sm:$0xff]  ;;  %v30_v15 = vld [vmem:[%s482_s1 + $0x40] sm:$0xff]  ;;  %s212_s6 = sshll.u32 %s355_s30, 4  ;;  %s213_s6 = int_to_ptr.vmem [resolvable:$true] %s212_s6 }
   0x8   :  { %v303_v14 = vpack.c.bf16 %v29_v13, %v28_v12  ;;  %v31_v16 = vld [vmem:[%s482_s1 + $0x48] sm:$0xff]  ;;  %v32_v18 = vld [vmem:[%s482_s1 + $0x50] sm:$0xff]  ;;  %v33_v19 = vld [vmem:[%s482_s1 + $0x58] sm:$0xff]  ;;  %v194_v53 = vshrl.u32 %v193_v52, 7  ;;  %s328_s7 = scalar_lea.vmem %s213_s6, 128  ;;  %p333_p1 = scmp.lt.s32.totalorder %s213_s6, %s213_s6 }
   0x9   :  { %v307_v17 = vpack.c.bf16 %v31_v16, %v30_v15  ;;  %v311_v20 = vpack.c.bf16 %v33_v19, %v32_v18  ;;  %v34_v21 = vld [vmem:[%s482_s1 + $0x60] sm:$0xff]  ;;  %v35_v22 = vld [vmem:[%s482_s1 + $0x68] sm:$0xff]  ;;  %v36_v24 = vld [vmem:[%s482_s1 + $0x70] sm:$0xff]  ;;  %p329_p0 = scmp.ne.s32.totalorder %s213_s6, %s328_s7  ;;  %p334_p2 = scmp.lt.s32.totalorder %s328_s7, %s328_s7 }
   0xa   :  { %v315_v23 = vpack.c.bf16 %v35_v22, %v34_v21  ;;  %v37_v25 = vld [vmem:[%s482_s1 + $0x78] sm:$0xff]  ;;  %v21_v27 = vld [vmem:[%s481_s0] sm:$0xff]  ;;  %v195_v55 = vsub.s32 0, %v194_v53 }
   0xb   :  { %v319_v26 = vpack.c.bf16 %v37_v25, %v36_v24  ;;  %v220_v28 = vld [vmem:[%s483_s2] ss:$0 sm:$0xff]  ;;  %p335_p3 = por %p334_p2, %p333_p1 }
   0xc   :  { %297 = vmatpush3.bf16.xpose.msk.msra.mxu0 %vm394_vm1, %v295_v8  ;;  %v188_v54 = vld [vmem:[%s484_s3] sm:$0x1] }
   0xd   :  { %298 = vmatprep.subr.bf16.mxu0 %v352_v2  ;;  %v190_v58 = vld [vmem:[%s485_s4] sm:$0x1]  ;;  %p336_p4 = pnand %p335_p3, %p329_p0 }
  0x14   :  { %301 = vmatpush3.bf16.xpose.msk.msra.mxu0 %vm394_vm1, %v299_v11 }
  0x15   :  { %302 = vmatprep.subr.bf16.mxu0 %v352_v2 }
  0x1c   :  { %305 = vmatpush3.bf16.xpose.msk.msra.mxu0 %vm394_vm1, %v303_v14 }
  0x1d   :  { %306 = vmatprep.subr.bf16.mxu0 %v352_v2 }
  0x24   :  { %309 = vmatpush3.bf16.xpose.msk.msra.mxu0 %vm394_vm1, %v307_v17 }
  0x25   :  { %310 = vmatprep.subr.bf16.mxu0 %v352_v2 }
  0x2c   :  { %313 = vmatpush3.bf16.xpose.msk.msra.mxu0 %vm394_vm1, %v311_v20 }
  0x2d   :  { %314 = vmatprep.subr.bf16.mxu0 %v352_v2 }
  0x34   :  { %317 = vmatpush3.bf16.xpose.msk.msra.mxu0 %vm394_vm1, %v315_v23 }
  0x35   :  { %318 = vmatprep.subr.bf16.mxu0 %v352_v2 }
  0x3c   :  { %321 = vmatpush3.bf16.xpose.msk.msra.mxu0 %vm394_vm1, %v319_v26 }
  0x43   :  { %288 = vmatmul.mubr.msk.f32.vlgmr.msra.gmra.mrb[0].mxu0 %vm45_vm0, %v21_v27 }
 0x116   :  { %v163_v29 = vpop.f32.mrb[0].mxu0 }
 0x117   :  { %v164_v30 = vadd.f32 %v220_v28, %v163_v29  ;;  %v289_v31 = vpop.f32.mrb[1].mxu0 }
 0x119   :  { %v167_v32 = vmax.f32 %v164_v30, 0.0 }
 0x11b   :  { %v168_v33 = vrot.slane %v167_v32, 4  ;;  %v174_v34 = vmul.f32 %v167_v32, %v167_v32 }
 0x11d   :  { %v169_v35 = vadd.f32 %v168_v33, %v167_v32  ;;  %v175_v36 = vrot.slane %v174_v34, 4 }
 0x11f   :  { %v170_v37 = vrot.slane %v169_v35, 2  ;;  %v176_v38 = vadd.f32 %v175_v36, %v174_v34 }
 0x121   :  { %v171_v39 = vadd.f32 %v170_v37, %v169_v35  ;;  %v177_v40 = vrot.slane %v176_v38, 2 }
 0x123   :  { %v178_v41 = vadd.f32 %v177_v40, %v176_v38  ;;  %v172_v42 = vrot.slane %v171_v39, 1 }
 0x125   :  { %v179_v43 = vrot.slane %v178_v41, 1  ;;  %v173_v44 = vadd.f32 %v172_v42, %v171_v39 }
 0x127   :  { %v180_v45 = vadd.f32 %v179_v43, %v178_v41  ;;  %v181_v46 = vmul.f32 0.125, %v173_v44 }
 0x129   :  { %v182_v47 = vmul.f32 0.125, %v180_v45  ;;  %v183_v48 = vmul.f32 %v181_v46, %v181_v46 }
 0x12b   :  { %v184_v49 = vsub.f32 %v182_v47, %v183_v48 }
 0x12d   :  { %v185_v50 = vmax.f32 %v184_v49, 0.0 }
 0x12f   :  { %v186_v51 = vadd.f32 1e-05, %v185_v50 }
 0x131   :  { %326 = vrsqrt.f32 %v186_v51 }
 0x13b   :  { %v327_v56 = vpop.eup %326 }
 0x13c   :  { %v189_v57 = vmul.f32 %v327_v56, %v188_v54 }
 0x13e   :  { %v191_v59 = vmul.f32 %v189_v57, %v181_v46  ;;  %v196_v60 = vrot.slane %v189_v57, %v195_v55 }
 0x140   :  { %v192_v61 = vsub.f32 %v190_v58, %v191_v59  ;;  %v197_v62 = vmul.f32 %v196_v60, %v167_v32 }
 0x142   :  { %v202_v63 = vrot.slane %v192_v61, %v195_v55 }
 0x144   :  { %v204_v0 = vadd.f32 %v202_v63, %v197_v62 }
 0x146   :  { %205 = vst [vmem:[#allocation2] sm:$0xff] %v204_v0 }
 0x147   :  { %339 = shalt.err (!%p336_p4)
}
 0x148   :  { %s340_s4 = scalar_lea.hbm %s486_s5, 128 }
 0x149   :  { %p341_p5 = scmp.ne.s32.totalorder %s486_s5, %s340_s4  ;;  %p344_p6 = scmp.lt.u32.totalorder %s340_s4, %s486_s5 }
 0x14b   :  { %p346_p7 = pnand %p344_p6, %p341_p5 }
 0x14d   :  { %349 = shalt.err (!%p346_p7)
}
 0x14e   :  { %215 = dma.vmem_to_hbm [thread:$0]  %s213_s6, 128, %s486_s5, [#allocation3]  }
 0x14f   :  { %350 = dma.done.wait [#allocation3], 128  }
 0x150   :  { %351 = vsyncadd [#allocation3], 4294967168 }
 0x151   :  { %219 = vsyncpa [#allocation3], 1 }

</bundles_post_ra>
